<compile_context>
chip_gen: v7x
topology: tpu7x:2x2x1
jax: 0.10.0
libtpu: 0.0.40
codegen_flags: <defaults>
</compile_context>

<pallas_src>
import jax
import jax.numpy as jnp
from jax.experimental import pallas as pl
from jax.experimental.pallas import tpu as pltpu

BN_EPS = 1e-5
KSIZE = 7
PAD = 1


def _block7x7_kernel(x_ref, w1_ref, sc1_ref, sh1_ref, w2_ref, sc2_ref, sh2_ref,
                     o_ref):
    """Processes Nb batch elements per grid step.

    x_ref  : (Nb, C, L)       input block, PyTorch NCL layout, f32
    w1_ref : (7*C, C)         conv1 taps stacked tap-major (k*C+ci, co), bf16
    sc1/sh1: (1, C)           folded BN1 scale / shift, f32
    w2_ref : (7*C, C)         conv2 taps, bf16
    sc2/sh2: (1, C)           folded BN2 scale / shift, f32
    o_ref  : (Nb, C, L-8)     output block, NCL layout, f32
    """
    Nb, C, L = x_ref.shape
    L1 = L + 2 * PAD - KSIZE + 1      # after conv1 (stride 1) = L - 4
    L2 = L1 + 2 * PAD - KSIZE + 1     # after conv2            = L - 8

    sc1, sh1 = sc1_ref[...], sh1_ref[...]
    sc2, sh2 = sc2_ref[...], sh2_ref[...]
    zrow = jnp.zeros((PAD, C), jnp.float32)

    def im2col(zpadded, lout):
        # zpadded: (lin, C) zero-padded sequence -> (lout, KSIZE*C)
        return jnp.concatenate(
            [zpadded[k:k + lout, :] for k in range(KSIZE)], axis=1)

    # ---- build conv1 im2col for all Nb elements (single fused matmul) ----
    x_lc = []
    cols1_parts = []
    for b in range(Nb):
        xb = x_ref[b].T.astype(jnp.float32)                 # (L, C) on-chip
        x_lc.append(xb)
        xp = jnp.concatenate([zrow, xb, zrow], axis=0)      # (L+2, C), pad=1
        cols1_parts.append(im2col(xp, L1))
    cols1 = jnp.concatenate(cols1_parts, axis=0).astype(jnp.bfloat16)

    # ---- conv1 (one MXU dot) + BN1 + ReLU ----
    a1 = jnp.dot(cols1, w1_ref[...], preferred_element_type=jnp.float32)
    h1 = jnp.maximum(a1 * sc1 + sh1, 0.0)                   # (Nb*L1, C) f32
    # Dropout(p=0.3): eval-mode identity.

    # ---- build conv2 im2col (zero-pad each element's intermediate) ----
    cols2_parts = []
    for b in range(Nb):
        h1b = h1[b * L1:(b + 1) * L1, :]
        h1p = jnp.concatenate([zrow, h1b, zrow], axis=0)    # (L1+2, C)
        cols2_parts.append(im2col(h1p, L2))
    cols2 = jnp.concatenate(cols2_parts, axis=0).astype(jnp.bfloat16)

    # ---- conv2 (one MXU dot) + BN2 + ReLU ----
    a2 = jnp.dot(cols2, w2_ref[...], preferred_element_type=jnp.float32)
    h2 = jnp.maximum(a2 * sc2 + sh2, 0.0)                   # (Nb*L2, C) f32
    # Dropout(p=0.3): eval-mode identity.

    # ---- cropped residual add + final ReLU, store back in NCL layout ----
    # residual[:, :, 0:-d] in NCL == rows 0:L2 of the (L, C) view.
    for b in range(Nb):
        res = x_lc[b][0:L2, :]
        out_lc = jnp.maximum(res + h2[b * L2:(b + 1) * L2, :], 0.0)
        o_ref[b] = out_lc.T.astype(o_ref.dtype)             # (C, L2)


def _fold_bn(gamma, beta, mean, var):
    scale = gamma / jnp.sqrt(var + BN_EPS)
    shift = beta - mean * scale
    return scale, shift


def _pick_nb(N, L1, C, L):
    """Batch elements per grid step: target ~512 matmul rows, stay in VMEM."""
    target_rows = 512
    nb = max(1, min(N, -(-target_rows // L1)))
    # double-buffered f32 input+output blocks per step; keep well under budget
    bytes_per_elem = 4 * (C * L + C * (L - 8)) * 2
    budget = 8 * 1024 * 1024
    nb = max(1, min(nb, budget // max(bytes_per_elem, 1), N))
    while N % nb:        # keep the grid exact
        nb -= 1
    return int(nb)


@jax.jit
def basic_block_7x7(x_ncl, w1, bn1, w2, bn2):
    """x_ncl: (N, C, L) float32 (PyTorch Conv1d layout). Returns (N, C, L-8)."""
    N, C, L = x_ncl.shape
    L1 = L - 4
    L2 = L - 8

    # Fold BN (eval mode) and stack conv taps into a (7*C, C) matrix so each
    # conv is a single matmul; feed the MXU in bf16.
    sc1, sh1 = _fold_bn(*bn1)
    sc2, sh2 = _fold_bn(*bn2)
    w1_s = jnp.transpose(w1, (2, 1, 0)).reshape(KSIZE * C, C).astype(jnp.bfloat16)
    w2_s = jnp.transpose(w2, (2, 1, 0)).reshape(KSIZE * C, C).astype(jnp.bfloat16)

    nb = _pick_nb(N, L1, C, L)

    out = pl.pallas_call(
        _block7x7_kernel,
        out_shape=jax.ShapeDtypeStruct((N, C, L2), jnp.float32),
        grid=(N // nb,),
        in_specs=[
            pl.BlockSpec((nb, C, L), lambda n: (n, 0, 0)),
            pl.BlockSpec((KSIZE * C, C), lambda n: (0, 0)),
            pl.BlockSpec((1, C), lambda n: (0, 0)),
            pl.BlockSpec((1, C), lambda n: (0, 0)),
            pl.BlockSpec((KSIZE * C, C), lambda n: (0, 0)),
            pl.BlockSpec((1, C), lambda n: (0, 0)),
            pl.BlockSpec((1, C), lambda n: (0, 0)),
        ],
        out_specs=pl.BlockSpec((nb, C, L2), lambda n: (n, 0, 0)),
        compiler_params=pltpu.CompilerParams(
            dimension_semantics=("parallel",),          # batch axis -> both TCs on v7x
            vmem_limit_bytes=48 * 1024 * 1024,          # < v7x 64 MiB physical
        ),
    )(x_ncl.astype(jnp.float32), w1_s,
      sc1.reshape(1, C).astype(jnp.float32), sh1.reshape(1, C).astype(jnp.float32),
      w2_s,
      sc2.reshape(1, C).astype(jnp.float32), sh2.reshape(1, C).astype(jnp.float32))
    return out


# ------------------------- pure-JAX reference -------------------------
def _ref_forward(x, w1, bn1, w2, bn2):
    def conv(z, w):
        return jax.lax.conv_general_dilated(
            z, w, window_strides=(1,), padding=[(PAD, PAD)],
            dimension_numbers=("NCH", "OIH", "NCH"))

    def bn(z, p):
        g, b, m, v = p
        return (z - m[None, :, None]) / jnp.sqrt(v[None, :, None] + BN_EPS) \
            * g[None, :, None] + b[None, :, None]

    out = jax.nn.relu(bn(conv(x, w1), bn1))          # dropout = identity (eval)
    out = jax.nn.relu(bn(conv(out, w2), bn2))
    d = x.shape[2] - out.shape[2]
    return jax.nn.relu(x[:, :, 0:-d] + out)


if __name__ == "__main__":
    # small shapes consistent with the module: inplanes7 == planes (residual add)
    N, C, L = 2, 8, 32
    key = jax.random.PRNGKey(0)
    ks = jax.random.split(key, 9)

    x = jax.random.normal(ks[0], (N, C, L), dtype=jnp.float32)

    # Conv1d weights: (out_channels, in_channels, kernel_size)
    w1 = 0.1 * jax.random.normal(ks[1], (C, C, KSIZE), dtype=jnp.float32)
    w2 = 0.1 * jax.random.normal(ks[2], (C, C, KSIZE), dtype=jnp.float32)

    # BatchNorm1d params (gamma, beta, running_mean, running_var)
    bn1 = (1.0 + 0.1 * jax.random.normal(ks[3], (C,), dtype=jnp.float32),
           0.1 * jax.random.normal(ks[4], (C,), dtype=jnp.float32),
           0.05 * jax.random.normal(ks[5], (C,), dtype=jnp.float32),
           1.0 + 0.1 * jax.random.uniform(ks[6], (C,), dtype=jnp.float32))
    bn2 = (1.0 + 0.1 * jax.random.normal(ks[7], (C,), dtype=jnp.float32),
           0.1 * jax.random.normal(ks[8], (C,), dtype=jnp.float32),
           jnp.zeros((C,), jnp.float32),
           jnp.ones((C,), jnp.float32))

    out = basic_block_7x7(x, w1, bn1, w2, bn2)
    out = jax.block_until_ready(out)

    ref = _ref_forward(x, w1, bn1, w2, bn2)
    assert out.shape == (N, C, L - 8), out.shape
    # tolerance loosened for the bf16 MXU feed (accumulation/epilogue stay f32)
    assert jnp.allclose(out, ref, rtol=2e-2, atol=2e-2), \
        float(jnp.max(jnp.abs(out - ref)))

    print("KERNEL_OK")
</pallas_src>

<mosaic_0001>
module attributes {stable_mosaic.version = 11 : i64} {
  func.func @_block7x7_kernel(%arg0: i32, %arg1: memref<2x8x32xf32, #tpu.memory_space<vmem>>, %arg2: memref<56x8xbf16, #tpu.memory_space<vmem>>, %arg3: memref<1x8xf32, #tpu.memory_space<vmem>>, %arg4: memref<1x8xf32, #tpu.memory_space<vmem>>, %arg5: memref<56x8xbf16, #tpu.memory_space<vmem>>, %arg6: memref<1x8xf32, #tpu.memory_space<vmem>>, %arg7: memref<1x8xf32, #tpu.memory_space<vmem>>, %arg8: memref<2x8x24xf32, #tpu.memory_space<vmem>>) attributes {dimension_semantics = [#tpu.dimension_semantics<parallel>], iteration_bounds = array<i64: 1>, scalar_prefetch = 0 : i64, scratch_operands = 0 : i64, tpu.core_type = #tpu.core_type<tc>, window_params = [{transform_indices = @transform_0, window_bounds = array<i64: 2, 8, 32>}, {pipeline_mode = #tpu.pipeline_mode<synchronous>, transform_indices = @transform_1, window_bounds = array<i64: 56, 8>}, {pipeline_mode = #tpu.pipeline_mode<synchronous>, transform_indices = @transform_2, window_bounds = array<i64: 1, 8>}, {pipeline_mode = #tpu.pipeline_mode<synchronous>, transform_indices = @transform_3, window_bounds = array<i64: 1, 8>}, {pipeline_mode = #tpu.pipeline_mode<synchronous>, transform_indices = @transform_4, window_bounds = array<i64: 56, 8>}, {pipeline_mode = #tpu.pipeline_mode<synchronous>, transform_indices = @transform_5, window_bounds = array<i64: 1, 8>}, {pipeline_mode = #tpu.pipeline_mode<synchronous>, transform_indices = @transform_6, window_bounds = array<i64: 1, 8>}, {transform_indices = @transform_7, window_bounds = array<i64: 2, 8, 24>}]} {
    %c0 = arith.constant 0 : index
    %c0_0 = arith.constant 0 : index
    %0 = vector.load %arg3[%c0, %c0_0] : memref<1x8xf32, #tpu.memory_space<vmem>>, vector<1x8xf32>
    %c0_1 = arith.constant 0 : index
    %c0_2 = arith.constant 0 : index
    %1 = vector.load %arg4[%c0_1, %c0_2] : memref<1x8xf32, #tpu.memory_space<vmem>>, vector<1x8xf32>
    %c0_3 = arith.constant 0 : index
    %c0_4 = arith.constant 0 : index
    %2 = vector.load %arg6[%c0_3, %c0_4] : memref<1x8xf32, #tpu.memory_space<vmem>>, vector<1x8xf32>
    %c0_5 = arith.constant 0 : index
    %c0_6 = arith.constant 0 : index
    %3 = vector.load %arg7[%c0_5, %c0_6] : memref<1x8xf32, #tpu.memory_space<vmem>>, vector<1x8xf32>
    %cst = arith.constant 0.000000e+00 : f32
    %4 = vector.broadcast %cst : f32 to vector<1x8xf32>
    %c0_7 = arith.constant 0 : index
    %c0_8 = arith.constant 0 : index
    %c0_9 = arith.constant 0 : index
    %5 = vector.load %arg1[%c0_7, %c0_8, %c0_9] : memref<2x8x32xf32, #tpu.memory_space<vmem>>, vector<1x8x32xf32>
    %6 = vector.shape_cast %5 : vector<1x8x32xf32> to vector<8x32xf32>
    %7 = tpu.transpose %6, [1, 0] : vector<8x32xf32> -> vector<32x8xf32>
    %8 = tpu.concatenate %4, %7, %4 in 0 : vector<1x8xf32>, vector<32x8xf32>, vector<1x8xf32> -> vector<34x8xf32>
    %9 = vector.extract_strided_slice %8 {offsets = [0, 0], sizes = [28, 8], strides = [1, 1]} : vector<34x8xf32> to vector<28x8xf32>
    %10 = vector.extract_strided_slice %8 {offsets = [1, 0], sizes = [28, 8], strides = [1, 1]} : vector<34x8xf32> to vector<28x8xf32>
    %11 = vector.extract_strided_slice %8 {offsets = [2, 0], sizes = [28, 8], strides = [1, 1]} : vector<34x8xf32> to vector<28x8xf32>
    %12 = vector.extract_strided_slice %8 {offsets = [3, 0], sizes = [28, 8], strides = [1, 1]} : vector<34x8xf32> to vector<28x8xf32>
    %13 = vector.extract_strided_slice %8 {offsets = [4, 0], sizes = [28, 8], strides = [1, 1]} : vector<34x8xf32> to vector<28x8xf32>
    %14 = vector.extract_strided_slice %8 {offsets = [5, 0], sizes = [28, 8], strides = [1, 1]} : vector<34x8xf32> to vector<28x8xf32>
    %15 = vector.extract_strided_slice %8 {offsets = [6, 0], sizes = [28, 8], strides = [1, 1]} : vector<34x8xf32> to vector<28x8xf32>
    %16 = tpu.concatenate %9, %10, %11, %12, %13, %14, %15 in 1 : vector<28x8xf32>, vector<28x8xf32>, vector<28x8xf32>, vector<28x8xf32>, vector<28x8xf32>, vector<28x8xf32>, vector<28x8xf32> -> vector<28x56xf32>
    %c1 = arith.constant 1 : index
    %c0_10 = arith.constant 0 : index
    %c0_11 = arith.constant 0 : index
    %17 = vector.load %arg1[%c1, %c0_10, %c0_11] : memref<2x8x32xf32, #tpu.memory_space<vmem>>, vector<1x8x32xf32>
    %18 = vector.shape_cast %17 : vector<1x8x32xf32> to vector<8x32xf32>
    %19 = tpu.transpose %18, [1, 0] : vector<8x32xf32> -> vector<32x8xf32>
    %20 = tpu.concatenate %4, %19, %4 in 0 : vector<1x8xf32>, vector<32x8xf32>, vector<1x8xf32> -> vector<34x8xf32>
    %21 = vector.extract_strided_slice %20 {offsets = [0, 0], sizes = [28, 8], strides = [1, 1]} : vector<34x8xf32> to vector<28x8xf32>
    %22 = vector.extract_strided_slice %20 {offsets = [1, 0], sizes = [28, 8], strides = [1, 1]} : vector<34x8xf32> to vector<28x8xf32>
    %23 = vector.extract_strided_slice %20 {offsets = [2, 0], sizes = [28, 8], strides = [1, 1]} : vector<34x8xf32> to vector<28x8xf32>
    %24 = vector.extract_strided_slice %20 {offsets = [3, 0], sizes = [28, 8], strides = [1, 1]} : vector<34x8xf32> to vector<28x8xf32>
    %25 = vector.extract_strided_slice %20 {offsets = [4, 0], sizes = [28, 8], strides = [1, 1]} : vector<34x8xf32> to vector<28x8xf32>
    %26 = vector.extract_strided_slice %20 {offsets = [5, 0], sizes = [28, 8], strides = [1, 1]} : vector<34x8xf32> to vector<28x8xf32>
    %27 = vector.extract_strided_slice %20 {offsets = [6, 0], sizes = [28, 8], strides = [1, 1]} : vector<34x8xf32> to vector<28x8xf32>
    %28 = tpu.concatenate %21, %22, %23, %24, %25, %26, %27 in 1 : vector<28x8xf32>, vector<28x8xf32>, vector<28x8xf32>, vector<28x8xf32>, vector<28x8xf32>, vector<28x8xf32>, vector<28x8xf32> -> vector<28x56xf32>
    %29 = tpu.concatenate %16, %28 in 0 : vector<28x56xf32>, vector<28x56xf32> -> vector<56x56xf32>
    %30 = arith.truncf %29 : vector<56x56xf32> to vector<56x56xbf16>
    %c0_12 = arith.constant 0 : index
    %c0_13 = arith.constant 0 : index
    %31 = vector.load %arg2[%c0_12, %c0_13] : memref<56x8xbf16, #tpu.memory_space<vmem>>, vector<56x8xbf16>
    %cst_14 = arith.constant dense<0.000000e+00> : vector<56x8xf32>
    %32 = tpu.matmul %30, %31, %cst_14 {dimension_numbers = #tpu.dot_dimension_numbers<[1], [0], [0], [1], [0, 0, 1, 1], [], []>} : vector<56x56xbf16>, vector<56x8xbf16>, vector<56x8xf32> -> vector<56x8xf32>
    %33 = vector.broadcast %0 : vector<1x8xf32> to vector<56x8xf32>
    %34 = arith.mulf %32, %33 : vector<56x8xf32>
    %35 = vector.broadcast %1 : vector<1x8xf32> to vector<56x8xf32>
    %36 = arith.addf %34, %35 : vector<56x8xf32>
    %cst_15 = arith.constant 0.000000e+00 : f32
    %37 = vector.broadcast %cst_15 : f32 to vector<56x8xf32>
    %38 = arith.maximumf %36, %37 : vector<56x8xf32>
    %39 = vector.extract_strided_slice %38 {offsets = [0, 0], sizes = [28, 8], strides = [1, 1]} : vector<56x8xf32> to vector<28x8xf32>
    %40 = tpu.concatenate %4, %39, %4 in 0 : vector<1x8xf32>, vector<28x8xf32>, vector<1x8xf32> -> vector<30x8xf32>
    %41 = vector.extract_strided_slice %40 {offsets = [0, 0], sizes = [24, 8], strides = [1, 1]} : vector<30x8xf32> to vector<24x8xf32>
    %42 = vector.extract_strided_slice %40 {offsets = [1, 0], sizes = [24, 8], strides = [1, 1]} : vector<30x8xf32> to vector<24x8xf32>
    %43 = vector.extract_strided_slice %40 {offsets = [2, 0], sizes = [24, 8], strides = [1, 1]} : vector<30x8xf32> to vector<24x8xf32>
    %44 = vector.extract_strided_slice %40 {offsets = [3, 0], sizes = [24, 8], strides = [1, 1]} : vector<30x8xf32> to vector<24x8xf32>
    %45 = vector.extract_strided_slice %40 {offsets = [4, 0], sizes = [24, 8], strides = [1, 1]} : vector<30x8xf32> to vector<24x8xf32>
    %46 = vector.extract_strided_slice %40 {offsets = [5, 0], sizes = [24, 8], strides = [1, 1]} : vector<30x8xf32> to vector<24x8xf32>
    %47 = vector.extract_strided_slice %40 {offsets = [6, 0], sizes = [24, 8], strides = [1, 1]} : vector<30x8xf32> to vector<24x8xf32>
    %48 = tpu.concatenate %41, %42, %43, %44, %45, %46, %47 in 1 : vector<24x8xf32>, vector<24x8xf32>, vector<24x8xf32>, vector<24x8xf32>, vector<24x8xf32>, vector<24x8xf32>, vector<24x8xf32> -> vector<24x56xf32>
    %49 = vector.extract_strided_slice %38 {offsets = [28, 0], sizes = [28, 8], strides = [1, 1]} : vector<56x8xf32> to vector<28x8xf32>
    %50 = tpu.concatenate %4, %49, %4 in 0 : vector<1x8xf32>, vector<28x8xf32>, vector<1x8xf32> -> vector<30x8xf32>
    %51 = vector.extract_strided_slice %50 {offsets = [0, 0], sizes = [24, 8], strides = [1, 1]} : vector<30x8xf32> to vector<24x8xf32>
    %52 = vector.extract_strided_slice %50 {offsets = [1, 0], sizes = [24, 8], strides = [1, 1]} : vector<30x8xf32> to vector<24x8xf32>
    %53 = vector.extract_strided_slice %50 {offsets = [2, 0], sizes = [24, 8], strides = [1, 1]} : vector<30x8xf32> to vector<24x8xf32>
    %54 = vector.extract_strided_slice %50 {offsets = [3, 0], sizes = [24, 8], strides = [1, 1]} : vector<30x8xf32> to vector<24x8xf32>
    %55 = vector.extract_strided_slice %50 {offsets = [4, 0], sizes = [24, 8], strides = [1, 1]} : vector<30x8xf32> to vector<24x8xf32>
    %56 = vector.extract_strided_slice %50 {offsets = [5, 0], sizes = [24, 8], strides = [1, 1]} : vector<30x8xf32> to vector<24x8xf32>
    %57 = vector.extract_strided_slice %50 {offsets = [6, 0], sizes = [24, 8], strides = [1, 1]} : vector<30x8xf32> to vector<24x8xf32>
    %58 = tpu.concatenate %51, %52, %53, %54, %55, %56, %57 in 1 : vector<24x8xf32>, vector<24x8xf32>, vector<24x8xf32>, vector<24x8xf32>, vector<24x8xf32>, vector<24x8xf32>, vector<24x8xf32> -> vector<24x56xf32>
    %59 = tpu.concatenate %48, %58 in 0 : vector<24x56xf32>, vector<24x56xf32> -> vector<48x56xf32>
    %60 = arith.truncf %59 : vector<48x56xf32> to vector<48x56xbf16>
    %c0_16 = arith.constant 0 : index
    %c0_17 = arith.constant 0 : index
    %61 = vector.load %arg5[%c0_16, %c0_17] : memref<56x8xbf16, #tpu.memory_space<vmem>>, vector<56x8xbf16>
    %cst_18 = arith.constant dense<0.000000e+00> : vector<48x8xf32>
    %62 = tpu.matmul %60, %61, %cst_18 {dimension_numbers = #tpu.dot_dimension_numbers<[1], [0], [0], [1], [0, 0, 1, 1], [], []>} : vector<48x56xbf16>, vector<56x8xbf16>, vector<48x8xf32> -> vector<48x8xf32>
    %63 = vector.broadcast %2 : vector<1x8xf32> to vector<48x8xf32>
    %64 = arith.mulf %62, %63 : vector<48x8xf32>
    %65 = vector.broadcast %3 : vector<1x8xf32> to vector<48x8xf32>
    %66 = arith.addf %64, %65 : vector<48x8xf32>
    %cst_19 = arith.constant 0.000000e+00 : f32
    %67 = vector.broadcast %cst_19 : f32 to vector<48x8xf32>
    %68 = arith.maximumf %66, %67 : vector<48x8xf32>
    %69 = vector.extract_strided_slice %7 {offsets = [0, 0], sizes = [24, 8], strides = [1, 1]} : vector<32x8xf32> to vector<24x8xf32>
    %70 = vector.extract_strided_slice %68 {offsets = [0, 0], sizes = [24, 8], strides = [1, 1]} : vector<48x8xf32> to vector<24x8xf32>
    %71 = arith.addf %69, %70 : vector<24x8xf32>
    %cst_20 = arith.constant 0.000000e+00 : f32
    %72 = vector.broadcast %cst_20 : f32 to vector<24x8xf32>
    %73 = arith.maximumf %71, %72 : vector<24x8xf32>
    %74 = tpu.transpose %73, [1, 0] : vector<24x8xf32> -> vector<8x24xf32>
    %c0_21 = arith.constant 0 : index
    %c0_22 = arith.constant 0 : index
    %c0_23 = arith.constant 0 : index
    %75 = vector.load %arg8[%c0_21, %c0_22, %c0_23] : memref<2x8x24xf32, #tpu.memory_space<vmem>>, vector<1x8x24xf32>
    %76 = vector.shape_cast %75 : vector<1x8x24xf32> to vector<8x24xf32>
    %77 = vector.shape_cast %74 : vector<8x24xf32> to vector<1x8x24xf32>
    tpu.vector_store %arg8[%c0_21, %c0_22, %c0_23], %77 {strides = array<i32>} : memref<2x8x24xf32, #tpu.memory_space<vmem>>, vector<1x8x24xf32>,
    %78 = vector.extract_strided_slice %19 {offsets = [0, 0], sizes = [24, 8], strides = [1, 1]} : vector<32x8xf32> to vector<24x8xf32>
    %79 = vector.extract_strided_slice %68 {offsets = [24, 0], sizes = [24, 8], strides = [1, 1]} : vector<48x8xf32> to vector<24x8xf32>
    %80 = arith.addf %78, %79 : vector<24x8xf32>
    %cst_24 = arith.constant 0.000000e+00 : f32
    %81 = vector.broadcast %cst_24 : f32 to vector<24x8xf32>
    %82 = arith.maximumf %80, %81 : vector<24x8xf32>
    %83 = tpu.transpose %82, [1, 0] : vector<24x8xf32> -> vector<8x24xf32>
    %c1_25 = arith.constant 1 : index
    %c0_26 = arith.constant 0 : index
    %c0_27 = arith.constant 0 : index
    %84 = vector.load %arg8[%c1_25, %c0_26, %c0_27] : memref<2x8x24xf32, #tpu.memory_space<vmem>>, vector<1x8x24xf32>
    %85 = vector.shape_cast %84 : vector<1x8x24xf32> to vector<8x24xf32>
    %86 = vector.shape_cast %83 : vector<8x24xf32> to vector<1x8x24xf32>
    tpu.vector_store %arg8[%c1_25, %c0_26, %c0_27], %86 {strides = array<i32>} : memref<2x8x24xf32, #tpu.memory_space<vmem>>, vector<1x8x24xf32>,
    return
  }
  func.func @transform_0(%arg0: i32) -> (i32, i32, i32) {
    %c0_i32 = arith.constant 0 : i32
    %c0_i32_0 = arith.constant 0 : i32
    %c0_i32_1 = arith.constant 0 : i32
    return %arg0, %c0_i32, %c0_i32_0 : i32, i32, i32
  }
  func.func @transform_1(%arg0: i32) -> (i32, i32) {
    %c0_i32 = arith.constant 0 : i32
    %c0_i32_0 = arith.constant 0 : i32
    %c0_i32_1 = arith.constant 0 : i32
    return %c0_i32, %c0_i32_0 : i32, i32
  }
  func.func @transform_2(%arg0: i32) -> (i32, i32) {
    %c0_i32 = arith.constant 0 : i32
    %c0_i32_0 = arith.constant 0 : i32
    %c0_i32_1 = arith.constant 0 : i32
    return %c0_i32, %c0_i32_0 : i32, i32
  }
  func.func @transform_3(%arg0: i32) -> (i32, i32) {
    %c0_i32 = arith.constant 0 : i32
    %c0_i32_0 = arith.constant 0 : i32
    %c0_i32_1 = arith.constant 0 : i32
    return %c0_i32, %c0_i32_0 : i32, i32
  }
  func.func @transform_4(%arg0: i32) -> (i32, i32) {
    %c0_i32 = arith.constant 0 : i32
    %c0_i32_0 = arith.constant 0 : i32
    %c0_i32_1 = arith.constant 0 : i32
    return %c0_i32, %c0_i32_0 : i32, i32
  }
  func.func @transform_5(%arg0: i32) -> (i32, i32) {
    %c0_i32 = arith.constant 0 : i32
    %c0_i32_0 = arith.constant 0 : i32
    %c0_i32_1 = arith.constant 0 : i32
    return %c0_i32, %c0_i32_0 : i32, i32
  }
  func.func @transform_6(%arg0: i32) -> (i32, i32) {
    %c0_i32 = arith.constant 0 : i32
    %c0_i32_0 = arith.constant 0 : i32
    %c0_i32_1 = arith.constant 0 : i32
    return %c0_i32, %c0_i32_0 : i32, i32
  }
  func.func @transform_7(%arg0: i32) -> (i32, i32, i32) {
    %c0_i32 = arith.constant 0 : i32
    %c0_i32_0 = arith.constant 0 : i32
    %c0_i32_1 = arith.constant 0 : i32
    return %arg0, %c0_i32, %c0_i32_0 : i32, i32, i32
  }
}

</mosaic_0001>

<bundles_post_ra>
// kernel: basic_block_7x7.1
= control target key start
LH: loop header
LB: loop body
LE: loop exit
PB: predicated region body
PF: predicated region fallthrough
CT: control target
= control target key end

     0   :  { %s2061_s0 = inlined_call_operand.vmem [shape: f32[2,8,32], index: 0, kind: input, shape index: {}]   ;;  %s2062_s1 = inlined_call_operand.vmem [shape: bf16[56,8], index: 1, kind: input, shape index: {}]   ;;  %s2063_s2 = inlined_call_operand.vmem [shape: f32[1,8], index: 2, kind: input, shape index: {}]   ;;  %s2064_s3 = inlined_call_operand.vmem [shape: f32[1,8], index: 3, kind: input, shape index: {}]   ;;  %s2065_s4 = inlined_call_operand.vmem [shape: bf16[56,8], index: 4, kind: input, shape index: {}]   ;;  %s2066_s5 = inlined_call_operand.vmem [shape: f32[1,8], index: 5, kind: input, shape index: {}]   ;;  %s2067_s6 = inlined_call_operand.vmem [shape: f32[1,8], index: 6, kind: input, shape index: {}]   ;;  %s2068_s7 = inlined_call_operand.hbm [shape: f32[2,8,24], index: 7, kind: output, shape index: {}]  }
   0x1   :  { %v32_v0 = vld [vmem:[%s2061_s0] sm:$0xff] }
   0x2   :  { %33 = vxpose.xlu0.b32.start.end [1/1] (short) (narrow) %v32_v0, 32 }
   0x3   :  { %12 = vsyncpa [#allocation3], 0  ;;  %v1087_v1 = vld [vmem:[%s2061_s0 + $0x8] sm:$0xff]  ;;  %vm69_vm0 = vcmask 1040384   ;;  %vm105_vm1 = vcmask 1045504   ;;  %s1411_s0 = smov 16  }
   0x4   :  { %vm85_vm2 = vcmask 1046528   ;;  %s1412_s28 = smov 8   ;;  %vm125_vm3 = vcmask 1044480   ;;  %vm145_vm4 = vcmask 1043456   ;;  %s1413_s29 = smov 24   ;;  %vm166_vm5 = vcmask 1042432  }
   0x5   :  { %vm188_vm6 = vcmask 1041408   ;;  %s1414_s30 = smov 32   ;;  %s1415_s8 = smov 40   ;;  %vm210_vm7 = vcmask 64512   ;;  %vm215_vm8 = vcmask 130048   ;;  %vm220_vm9 = vcmask 195584  }
   0x6   :  { %s1416_s9 = smov 48   ;;  %vm225_vm10 = vcmask 261120   ;;  %vm230_vm11 = vcmask 326656   ;;  %vm235_vm12 = vcmask 392192   ;;  %vm484_vm13 = vcmask 457728  }
   0x7   :  { %vm1418_vm14 = vmmov 0  }
   0xf   :  { %242 = vxpose.xlu0.b32.start.end [1/1] (short) (narrow) %v1087_v1, 32 }
  0x82   :  { %v1467_v2 = vpop.trf.xlu0 }
  0x83   :  { %v70_v7 = vrot.slane %v1467_v2, 7 }
  0x85   :  { %v1505_v21 = vsel %vm69_vm0, 0.0, %v70_v7 }
  0x86   :  { %v1469_v3 = vpop.trf.xlu0  ;;  %v86_v27 = vrot.slane %v1505_v21, 1  ;;  %v106_v37 = vrot.slane %v1505_v21, 2  ;;  %v126_v47 = vrot.slane %v1505_v21, 3  ;;  %v146_v61 = vrot.slane %v1505_v21, 4 }
  0x87   :  { %v71_v4 = vrot.slane %v1469_v3, 7 }
  0x89   :  { %v1480_v9 = vsel %vm69_vm0, %v70_v7, %v71_v4 }
  0x8a   :  { %v1472_v5 = vpop.trf.xlu0  ;;  %v107_v14 = vrot.slane %v1480_v9, 2  ;;  %v87_v24 = vrot.slane %v1480_v9, 1  ;;  %v127_v43 = vrot.slane %v1480_v9, 3  ;;  %v147_v54 = vrot.slane %v1480_v9, 4 }
  0x8b   :  { %v73_v6 = vrot.slane %v1472_v5, 7  ;;  %v168_v7 = vrot.slane %v1480_v9, 5 }
  0x8c   :  { %v88_v32 = vsel %vm85_vm2, %v86_v27, %v87_v24  ;;  %v108_v42 = vsel %vm105_vm1, %v106_v37, %v107_v14  ;;  %v128_v55 = vsel %vm125_vm3, %v126_v47, %v127_v43 }
  0x8d   :  { %v1477_v8 = vsel %vm69_vm0, %v71_v4, %v73_v6 }
  0x8e   :  { %v1482_v10 = vpop.trf.xlu0  ;;  %v109_v12 = vrot.slane %v1477_v8, 2 }
  0x8f   :  { %v75_v11 = vrot.slane %v1482_v10, 7 }
  0x90   :  { %v110_v18 = vsel %vm105_vm1, %v107_v14, %v109_v12 }
  0x91   :  { %v1489_v13 = vsel %vm69_vm0, %v73_v6, %v75_v11  ;;  %v148_v6 = vsel %vm145_vm4, %v146_v61, %v147_v54 }
  0x92   :  { %v1492_v15 = vpop.trf.xlu0  ;;  %v111_v16 = vrot.slane %v1489_v13, 2  ;;  %v91_v47 = vrot.slane %v1489_v13, 1 }
  0x93   :  { %v278_v17 = vrot.slane %v1492_v15, 7 }
  0x94   :  { %v1204_v19 = vpack.i.bf16 %v111_v16, %v110_v18 }
  0x95   :  { %v1508_v22 = vsel %vm69_vm0, 0.0, %v278_v17 }
  0x96   :  { %1205 = vrot.lane.b32.xlu0 %v1204_v19, %s1411_s0  ;;  %v1502_v20 = vpop.trf.xlu0  ;;  %v293_v28 = vrot.slane %v1508_v22, 1  ;;  %v312_v34 = vrot.slane %v1508_v22, 2  ;;  %v331_v44 = vrot.slane %v1508_v22, 3  ;;  %v350_v57 = vrot.slane %v1508_v22, 4 }
  0x97   :  { %v279_v23 = vrot.slane %v1502_v20, 7  ;;  %v370_v14 = vrot.slane %v1508_v22, 5 }
  0x99   :  { %v1513_v25 = vsel %vm69_vm0, %v278_v17, %v279_v23 }
  0x9a   :  { %v1515_v26 = vpop.trf.xlu0  ;;  %v294_v29 = vrot.slane %v1513_v25, 1  ;;  %v313_v30 = vrot.slane %v1513_v25, 2  ;;  %v332_v39 = vrot.slane %v1513_v25, 3  ;;  %v351_v48 = vrot.slane %v1513_v25, 4 }
  0x9b   :  { %v281_v31 = vrot.slane %v1515_v26, 7  ;;  %v371_v62 = vrot.slane %v1513_v25, 5 }
  0x9c   :  { %v295_v33 = vsel %vm85_vm2, %v293_v28, %v294_v29  ;;  %v314_v38 = vsel %vm105_vm1, %v312_v34, %v313_v30  ;;  %v333_v49 = vsel %vm125_vm3, %v331_v44, %v332_v39  ;;  %v352_v0 = vsel %vm145_vm4, %v350_v57, %v351_v48 }
  0x9d   :  { %v1169_v35 = vpack.i.bf16 %v88_v32, %v295_v33  ;;  %v1535_v40 = vsel %vm69_vm0, %v279_v23, %v281_v31  ;;  %v1174_v46 = vpack.i.bf16 %v108_v42, %v314_v38  ;;  %v1179_v59 = vpack.i.bf16 %v128_v55, %v333_v49 }
  0x9e   :  { %v261_v36 = vpop.trf.xlu0  ;;  %v315_v50 = vrot.slane %v1535_v40, 2  ;;  %v353_v58 = vrot.slane %v1535_v40, 4  ;;  %v394_v17 = vrot.slane %v1535_v40, 6  ;;  %v1184_v18 = vpack.i.bf16 %v148_v6, %v352_v0 }
  0x9f   :  { %v283_v41 = vrot.slane %v261_v36, 7  ;;  %1170 = vrot.lane.b32.xlu1 %v1169_v35, %s1412_s28  ;;  %v167_v23 = vrot.slane %v1505_v21, 5  ;;  %v372_v27 = vsel %vm166_vm5, %v370_v14, %v371_v62  ;;  %v392_v32 = vrot.slane %v1513_v25, 6 }
  0xa0   :  { %v190_v34 = vrot.slane %v1480_v9, 6  ;;  %v391_v35 = vrot.slane %v1508_v22, 6  ;;  %v189_v38 = vrot.slane %v1505_v21, 6  ;;  %v89_v44 = vrot.slane %v1477_v8, 1 }
  0xa1   :  { %v1542_v45 = vsel %vm69_vm0, %v281_v31, %v283_v41  ;;  %v1553_v53 = vsel %vm69_vm0, %v283_v41, 0.0  ;;  %v169_v33 = vsel %vm166_vm5, %v167_v23, %v168_v7  ;;  %v131_v55 = vrot.slane %v1489_v13, 3 }
  0xa2   :  { %v317_v51 = vrot.slane %v1542_v45, 2  ;;  %v355_v52 = vrot.slane %v1542_v45, 4  ;;  %v398_v63 = vrot.slane %v1553_v53, 6  ;;  %v396_v4 = vrot.slane %v1542_v45, 6 }
  0xa3   :  { %1175 = vrot.lane.b32.xlu1 %v1174_v46, %s1411_s0  ;;  %v1189_v36 = vpack.i.bf16 %v169_v33, %v372_v27  ;;  %v393_v41 = vsel %vm188_vm6, %v391_v35, %v392_v32  ;;  %v191_v42 = vsel %vm188_vm6, %v189_v38, %v190_v34  ;;  %v90_v49 = vsel %vm85_vm2, %v87_v24, %v89_v44  ;;  %v1381_v38 = vld [vmem:[%s2062_s1 + $0x10] sm:$0xff]  }
  0xa4   :  { %v318_v56 = vsel %vm105_vm1, %v315_v50, %v317_v51  ;;  %v356_v1 = vsel %vm145_vm4, %v353_v58, %v355_v52  ;;  %v397_v28 = vsel %vm188_vm6, %v394_v17, %v396_v4  ;;  %v399_v31 = vsel %vm188_vm6, %v396_v4, %v398_v63 }
  0xa5   :  { %v1264_v60 = vpack.i.bf16 %v317_v51, %v318_v56  ;;  %v1274_v19 = vpack.i.bf16 %v355_v52, %v356_v1  ;;  %v1284_v37 = vpack.i.bf16 %v399_v31, %v397_v28  ;;  %v1194_v46 = vpack.i.bf16 %v191_v42, %v393_v41 }
  0xa6   :  { %v129_v51 = vrot.slane %v1477_v8, 3  ;;  %v1199_v52 = vpack.i.bf16 %v91_v47, %v90_v49  ;;  %v149_v57 = vrot.slane %v1477_v8, 4  ;;  %v296_v61 = vrot.slane %v1535_v40, 1 }
  0xa7   :  { %1180 = vrot.lane.b32.xlu1 %v1179_v59, %s1413_s29  ;;  %1265 = vrot.lane.b32.xlu0 %v1264_v60, %s1411_s0  ;;  %v151_v60 = vrot.slane %v1489_v13, 4  ;;  %v316_v4 = vsel %vm105_vm1, %v313_v30, %v315_v50  ;;  %v334_v6 = vrot.slane %v1535_v40, 3  ;;  %v373_v28 = vrot.slane %v1535_v40, 5 }
  0xa8   :  { %v130_v56 = vsel %vm125_vm3, %v127_v43, %v129_v51  ;;  %v150_v24 = vsel %vm145_vm4, %v147_v54, %v149_v57  ;;  %v297_v0 = vsel %vm85_vm2, %v294_v29, %v296_v61  ;;  %v92_v43 = vsel %vm85_vm2, %v89_v44, %v91_v47  ;;  %v1382_v47 = vld [vmem:[%s2062_s1 + $0x18] ss:$0 sps:$4 sm:$0xff]  }
  0xa9   :  { %v1209_v59 = vpack.i.bf16 %v131_v55, %v130_v56  ;;  %v1214_v63 = vpack.i.bf16 %v151_v60, %v150_v24  ;;  %v1219_v1 = vpack.i.bf16 %v297_v0, %v92_v43  ;;  %v112_v29 = vsel %vm105_vm1, %v109_v12, %v111_v16 }
  0xaa   :  { %v1224_v54 = vpack.i.bf16 %v316_v4, %v112_v29  ;;  %v335_v14 = vsel %vm125_vm3, %v332_v39, %v334_v6  ;;  %v132_v30 = vsel %vm125_vm3, %v129_v51, %v131_v55  ;;  %v354_v12 = vsel %vm145_vm4, %v351_v48, %v353_v58  ;;  %v1379_v39 = vld [vmem:[%s2062_s1] sm:$0xff]   ;;  %v1380_v58 = vld [vmem:[%s2062_s1 + $0x8] sm:$0xff]  }
  0xab   :  { %1185 = vrot.lane.b32.xlu1 %v1184_v18, %s1414_s30  ;;  %1275 = vrot.lane.b32.xlu0 %v1274_v19, %s1414_s30  ;;  %v83_v18 = vsel %vm69_vm0, %v75_v11, 0.0  ;;  %v1229_v50 = vpack.i.bf16 %v335_v14, %v132_v30  ;;  %v172_v16 = vrot.slane %v1489_v13, 5  ;;  %v152_v10 = vsel %vm145_vm4, %v149_v57, %v151_v60 }
  0xac   :  { %v174_v19 = vrot.slane %v83_v18, 5  ;;  %v170_v11 = vrot.slane %v1477_v8, 5  ;;  %v1234_v23 = vpack.i.bf16 %v354_v12, %v152_v10  ;;  %1122 = vmatprep.subr.bf16.mxu0 %v1379_v39  ;;  %v196_v33 = vrot.slane %v83_v18, 6 }
  0xad   :  { %1123 = vmatpush3.bf16.msra.mxu0 %v1379_v39  ;;  %v374_v35 = vsel %vm166_vm5, %v371_v62, %v373_v28  ;;  %v298_v44 = vrot.slane %v1542_v45, 1  ;;  %v498_v51 = vsel %vm145_vm4, %v1382_v47, 0  ;;  %v336_v55 = vrot.slane %v1542_v45, 3 }
  0xae   :  { %v175_v27 = vsel %vm166_vm5, %v172_v16, %v174_v19  ;;  %v171_v48 = vsel %vm166_vm5, %v168_v7, %v170_v11  ;;  %1124 = vmatprep.subr.bf16.mxu0 %v1380_v58  ;;  %v192_v7 = vrot.slane %v1477_v8, 6 }
  0xaf   :  { %1190 = vrot.lane.b32.xlu1 %v1189_v36, %s1415_s8  ;;  %1285 = vrot.lane.b32.xlu0 %v1284_v37, %s1416_s9  ;;  %v1239_v31 = vpack.i.bf16 %v175_v27, %v171_v48  ;;  %v194_v36 = vrot.slane %v1489_v13, 6  ;;  %v173_v37 = vsel %vm166_vm5, %v170_v11, %v172_v16  ;;  %v299_v49 = vsel %vm85_vm2, %v296_v61, %v298_v44 }
  0xb0   :  { %v1244_v41 = vpack.i.bf16 %v374_v35, %v173_v37  ;;  %v193_v62 = vsel %vm188_vm6, %v190_v34, %v192_v7  ;;  %v395_v34 = vsel %vm188_vm6, %v392_v32, %v394_v17  ;;  %v337_v60 = vsel %vm125_vm3, %v334_v6, %v336_v55 }
  0xb1   :  { %1125 = vmatpush3.bf16.msra.mxu0 %v1380_v58  ;;  %v197_v42 = vsel %vm188_vm6, %v194_v36, %v196_v33  ;;  %v195_v56 = vsel %vm188_vm6, %v192_v7, %v194_v36  ;;  %v375_v61 = vrot.slane %v1542_v45, 5  ;;  %v1269_v24 = vpack.i.bf16 %v336_v55, %v337_v60 }
  0xb2   :  { %1126 = vmatprep.subr.bf16.mxu0 %v1381_v38  ;;  %v1259_v57 = vpack.i.bf16 %v395_v34, %v195_v56 }
  0xb3   :  { %1195 = vrot.lane.b32.xlu1 %v1194_v46, %s1416_s9  ;;  %v1249_v46 = vpack.i.bf16 %v197_v42, %v193_v62 }
  0xb5   :  { %1127 = vmatpush3.bf16.msra.mxu0 %v1381_v38 }
  0xb6   :  { %1158 = vmatprep.subr.msk.bf16.mxu0 %vm145_vm4, %v1382_v47 }
  0xb7   :  { %1200 = vrot.lane.b32.xlu1 %v1199_v52, %s1412_s28  ;;  %v1254_v52 = vpack.i.bf16 %v298_v44, %v299_v49 }
  0xb9   :  { %1129 = vmatpush3.bf16.msra.mxu0 %v498_v51 }
  0xbb   :  { %1210 = vrot.lane.b32.xlu1 %v1209_v59, %s1413_s29  ;;  %v377_v59 = vrot.slane %v1553_v53, 5 }
  0xbd   :  { %v378_v17 = vsel %vm166_vm5, %v375_v61, %v377_v59 }
  0xbf   :  { %1215 = vrot.lane.b32.xlu1 %v1214_v63, %s1414_s30  ;;  %v376_v63 = vsel %vm166_vm5, %v373_v28, %v375_v61 }
  0xc0   :  { %v1279_v32 = vpack.i.bf16 %v378_v17, %v376_v63 }
  0xc3   :  { %1220 = vrot.lane.b32.xlu1 %v1219_v1, %s1412_s28 }
  0xc7   :  { %1225 = vrot.lane.b32.xlu1 %v1224_v54, %s1411_s0 }
  0xcb   :  { %1230 = vrot.lane.b32.xlu1 %v1229_v50, %s1413_s29 }
  0xcf   :  { %1235 = vrot.lane.b32.xlu1 %v1234_v23, %s1414_s30 }
  0xd3   :  { %1240 = vrot.lane.b32.xlu1 %v1239_v31, %s1415_s8 }
  0xd7   :  { %1245 = vrot.lane.b32.xlu1 %v1244_v41, %s1415_s8 }
  0xdb   :  { %1250 = vrot.lane.b32.xlu1 %v1249_v46, %s1416_s9 }
  0xdf   :  { %1255 = vrot.lane.b32.xlu1 %v1254_v52, %s1412_s28 }
  0xe3   :  { %1260 = vrot.lane.b32.xlu1 %v1259_v57, %s1416_s9 }
  0xe7   :  { %1270 = vrot.lane.b32.xlu1 %v1269_v24, %s1413_s29 }
  0xeb   :  { %1280 = vrot.lane.b32.xlu1 %v1279_v32, %s1415_s8 }
 0x108   :  { %v1206_v12 = vpop.permute.xlu0 %1205 }
 0x109   :  { %v1208_v27 = vunpack.i.h.bf16 %v1206_v12  ;;  %v1207_v58 = vunpack.i.l.bf16 %v1206_v12 }
 0x111   :  { %v1171_v0 = vpop.permute.xlu1 %1170 }
 0x112   :  { %v1172_v16 = vunpack.i.l.bf16 %v1171_v0  ;;  %v1173_v39 = vunpack.i.h.bf16 %v1171_v0 }
 0x114   :  { %v412_v31 = vsel %vm210_vm7, %v1508_v22, %v1172_v16  ;;  %v211_v42 = vsel %vm210_vm7, %v1505_v21, %v1173_v39 }
 0x115   :  { %v1176_v43 = vpop.permute.xlu1 %1175 }
 0x116   :  { %v1177_v23 = vunpack.i.l.bf16 %v1176_v43  ;;  %v1178_v28 = vunpack.i.h.bf16 %v1176_v43 }
 0x118   :  { %v416_v44 = vsel %vm215_vm8, %v412_v31, %v1177_v23  ;;  %v216_v46 = vsel %vm215_vm8, %v211_v42, %v1178_v28 }
 0x119   :  { %v1181_v1 = vpop.permute.xlu1 %1180 }
 0x11a   :  { %v1182_v48 = vunpack.i.l.bf16 %v1181_v1  ;;  %v1183_v33 = vunpack.i.h.bf16 %v1181_v1 }
 0x11c   :  { %v420_v47 = vsel %vm220_vm9, %v416_v44, %v1182_v48 }
 0x11d   :  { %v1186_v53 = vpop.permute.xlu1 %1185 }
 0x11e   :  { %v1187_v35 = vunpack.i.l.bf16 %v1186_v53  ;;  %v1188_v36 = vunpack.i.h.bf16 %v1186_v53  ;;  %v1266_v53 = vpop.permute.xlu0 %1265 }
 0x120   :  { %v424_v52 = vsel %vm225_vm10, %v420_v47, %v1187_v35 }
 0x121   :  { %v1191_v4 = vpop.permute.xlu1 %1190 }
 0x122   :  { %v1192_v37 = vunpack.i.l.bf16 %v1191_v4  ;;  %v1193_v49 = vunpack.i.h.bf16 %v1191_v4  ;;  %v1276_v44 = vpop.permute.xlu0 %1275 }
 0x124   :  { %v428_v56 = vsel %vm230_vm11, %v424_v52, %v1192_v37  ;;  %v1268_v37 = vunpack.i.h.bf16 %v1266_v53 }
 0x125   :  { %v1708_v6 = vpop.permute.xlu1 %1195 }
 0x126   :  { %v1198_v34 = vunpack.i.h.bf16 %v1708_v6  ;;  %v1197_v57 = vunpack.i.l.bf16 %v1708_v6 }
 0x128   :  { %v1761_v39 = vsel %vm235_vm12, %v428_v56, %v1197_v57 }
 0x129   :  { %v1201_v29 = vpop.permute.xlu1 %1200 }
 0x12a   :  { %v1202_v10 = vunpack.i.l.bf16 %v1201_v29  ;;  %v1203_v62 = vunpack.i.h.bf16 %v1201_v29 }
 0x12c   :  { %v212_v7 = vsel %vm210_vm7, %v1480_v9, %v1202_v10  ;;  %v221_v9 = vsel %vm220_vm9, %v216_v46, %v1183_v33  ;;  %v214_v61 = vsel %vm210_vm7, %v1489_v13, %v1203_v62 }
 0x12d   :  { %v1710_v54 = vpop.permute.xlu1 %1210  ;;  %v217_v21 = vsel %vm215_vm8, %v212_v7, %v1207_v58  ;;  %v226_v55 = vsel %vm225_vm10, %v221_v9, %v1188_v36 }
 0x12e   :  { %v1212_v38 = vunpack.i.l.bf16 %v1710_v54  ;;  %v1213_v24 = vunpack.i.h.bf16 %v1710_v54  ;;  %v231_v43 = vsel %vm230_vm11, %v226_v55, %v1193_v49  ;;  %v219_v54 = vsel %vm215_vm8, %v214_v61, %v1208_v27  ;;  %v1286_v61 = vpop.permute.xlu0 %1285 }
 0x12f   :  { %v236_v13 = vsel %vm235_vm12, %v231_v43, %v1198_v34 }
 0x130   :  { %v222_v59 = vsel %vm220_vm9, %v217_v21, %v1212_v38  ;;  %v224_v23 = vsel %vm220_vm9, %v219_v54, %v1213_v24  ;;  %v1267_v21 = vunpack.i.l.bf16 %v1266_v53 }
 0x131   :  { %v1712_v14 = vpop.permute.xlu1 %1215 }
 0x132   :  { %v1217_v22 = vunpack.i.l.bf16 %v1712_v14  ;;  %v1218_v32 = vunpack.i.h.bf16 %v1712_v14 }
 0x134   :  { %v227_v63 = vsel %vm225_vm10, %v222_v59, %v1217_v22 }
 0x135   :  { %v1714_v18 = vpop.permute.xlu1 %1220 }
 0x136   :  { %v1222_v0 = vunpack.i.l.bf16 %v1714_v18  ;;  %v1223_v48 = vunpack.i.h.bf16 %v1714_v18 }
 0x138   :  { %v213_v58 = vsel %vm210_vm7, %v1477_v8, %v1222_v0  ;;  %v440_v8 = vrot.slane %v1761_v39, 4  ;;  %v413_v47 = vsel %vm210_vm7, %v1513_v25, %v1223_v48  ;;  %v1277_v0 = vunpack.i.l.bf16 %v1276_v44 }
 0x139   :  { %v1716_v30 = vpop.permute.xlu1 %1225 }
 0x13a   :  { %v1227_v4 = vunpack.i.l.bf16 %v1716_v30  ;;  %v1228_v7 = vunpack.i.h.bf16 %v1716_v30 }
 0x13c   :  { %v218_v31 = vsel %vm215_vm8, %v213_v58, %v1227_v4  ;;  %v417_v55 = vsel %vm215_vm8, %v413_v47, %v1228_v7 }
 0x13d   :  { %v1718_v50 = vpop.permute.xlu1 %1230 }
 0x13e   :  { %v1232_v12 = vunpack.i.l.bf16 %v1718_v50  ;;  %v1233_v62 = vunpack.i.h.bf16 %v1718_v50 }
 0x140   :  { %v223_v38 = vsel %vm220_vm9, %v218_v31, %v1232_v12 }
 0x141   :  { %v1720_v19 = vpop.permute.xlu1 %1235 }
 0x142   :  { %v1237_v28 = vunpack.i.l.bf16 %v1720_v19  ;;  %v1238_v49 = vunpack.i.h.bf16 %v1720_v19 }
 0x144   :  { %v228_v22 = vsel %vm225_vm10, %v223_v38, %v1237_v28 }
 0x145   :  { %v1722_v11 = vpop.permute.xlu1 %1240 }
 0x146   :  { %v1242_v51 = vunpack.i.l.bf16 %v1722_v11  ;;  %v1243_v6 = vunpack.i.h.bf16 %v1722_v11  ;;  %v229_v11 = vsel %vm225_vm10, %v224_v23, %v1218_v32  ;;  %v1278_v32 = vunpack.i.h.bf16 %v1276_v44 }
 0x148   :  { %v232_v1 = vsel %vm230_vm11, %v227_v63, %v1242_v51  ;;  %v234_v33 = vsel %vm230_vm11, %v229_v11, %v1243_v6  ;;  %v1288_v6 = vunpack.i.h.bf16 %v1286_v61 }
 0x149   :  { %v1729_v41 = vpop.permute.xlu1 %1245 }
 0x14a   :  { %v1247_v27 = vunpack.i.l.bf16 %v1729_v41  ;;  %v1248_v30 = vunpack.i.h.bf16 %v1729_v41  ;;  %v421_v41 = vsel %vm220_vm9, %v417_v55, %v1233_v62 }
 0x14c   :  { %v233_v51 = vsel %vm230_vm11, %v228_v22, %v1247_v27 }
 0x14d   :  { %v1251_v60 = vpop.permute.xlu1 %1250 }
 0x14e   :  { %v1252_v17 = vunpack.i.l.bf16 %v1251_v60  ;;  %v1253_v14 = vunpack.i.h.bf16 %v1251_v60  ;;  %v425_v60 = vsel %vm225_vm10, %v421_v41, %v1238_v49 }
 0x14f   :  { %v429_v24 = vsel %vm230_vm11, %v425_v60, %v1248_v30 }
 0x150   :  { %v237_v29 = vsel %vm235_vm12, %v232_v1, %v1252_v17  ;;  %v239_v18 = vsel %vm235_vm12, %v234_v33, %v1253_v14  ;;  %v1383_v33 = vld [vmem:[%s2065_s4] sm:$0xff]  }
 0x151   :  { %v1256_v16 = vpop.permute.xlu1 %1255  ;;  %v452_v10 = vpack.c.bf16 %v237_v29, %v236_v13  ;;  %v451_v34 = vsel %vm145_vm4, %v239_v18, %v440_v8  ;;  %v1287_v13 = vunpack.i.l.bf16 %v1286_v61 }
 0x152   :  { %v1258_v35 = vunpack.i.h.bf16 %v1256_v16  ;;  %v1257_v36 = vunpack.i.l.bf16 %v1256_v16 }
 0x153   :  { %1130 = vmatprep.mubr.msk.bf16.mxu0 %vm484_vm13, %v452_v10 }
 0x154   :  { %v415_v9 = vsel %vm210_vm7, %v1542_v45, %v1258_v35  ;;  %v414_v52 = vsel %vm210_vm7, %v1535_v40, %v1257_v36  ;;  %v1417_v35 = vmov 0.0   ;;  %v1096_v36 = vld [vmem:[%s2063_s2] ss:$0 sm:$0xff] }
 0x155   :  { %v1261_v42 = vpop.permute.xlu1 %1260  ;;  %v418_v45 = vsel %vm215_vm8, %v414_v52, %v1267_v21  ;;  %v419_v40 = vsel %vm215_vm8, %v415_v9, %v1268_v37  ;;  %1138 = vmatprep.subr.bf16.mxu1 %v1417_v35  ;;  %v1822_v37 = vld [vmem:[%s2064_s3] ss:$0 sm:$0xff]  ;;  %v1384_v21 = vld [vmem:[%s2065_s4 + $0x8] sm:$0xff]   ;;  %1146 = vmatprep.mubr.msk.bf16.mxu1 %vm1418_vm14, %v1417_v35 }
 0x156   :  { %v1262_v46 = vunpack.i.l.bf16 %v1261_v42  ;;  %v1263_v25 = vunpack.i.h.bf16 %v1261_v42  ;;  %1139 = vmatpush3.bf16.msra.mxu1 %v1383_v33 }
 0x157   :  { %1140 = vmatprep.subr.bf16.mxu1 %v1417_v35 }
 0x158   :  { %v238_v50 = vsel %vm235_vm12, %v233_v51, %v1262_v46  ;;  %v433_v43 = vsel %vm235_vm12, %v429_v24, %v1263_v25  ;;  %v1385_v24 = vld [vmem:[%s2065_s4 + $0x10] sm:$0xff]  }
 0x159   :  { %v453_v56 = vpack.c.bf16 %v451_v34, %v238_v50  ;;  %v1271_v19 = vpop.permute.xlu1 %1270  ;;  %v441_v12 = vrot.slane %v433_v43, 4 }
 0x15a   :  { %v1273_v57 = vunpack.i.h.bf16 %v1271_v19  ;;  %v1272_v59 = vunpack.i.l.bf16 %v1271_v19  ;;  %1141 = vmatpush3.bf16.msra.mxu1 %v1384_v21 }
 0x15b   :  { %1131 = vmatmul.mubr.msk.bf16.vlgmr.msra.gmra.mrb[0].mxu0 %vm484_vm13, %v453_v56  ;;  %v442_v11 = vsel %vm145_vm4, %v440_v8, %v441_v12  ;;  %1142 = vmatprep.subr.bf16.mxu1 %v1417_v35 }
 0x15c   :  { %v422_v63 = vsel %vm220_vm9, %v418_v45, %v1272_v59  ;;  %v423_v17 = vsel %vm220_vm9, %v419_v40, %v1273_v57 }
 0x15d   :  { %v1281_v1 = vpop.permute.xlu1 %1280  ;;  %v426_v29 = vsel %vm225_vm10, %v422_v63, %v1277_v0  ;;  %v427_v54 = vsel %vm225_vm10, %v423_v17, %v1278_v32 }
 0x15e   :  { %v1283_v53 = vunpack.i.h.bf16 %v1281_v1  ;;  %v1282_v4 = vunpack.i.l.bf16 %v1281_v1  ;;  %1143 = vmatpush3.bf16.msra.mxu1 %v1385_v24 }
 0x15f   :  { %1144 = vmatprep.subr.bf16.mxu1 %v1417_v35 }
 0x160   :  { %v430_v14 = vsel %vm230_vm11, %v426_v29, %v1282_v4  ;;  %v431_v16 = vsel %vm230_vm11, %v427_v54, %v1283_v53 }
 0x161   :  { %v434_v10 = vsel %vm235_vm12, %v430_v14, %v1287_v13  ;;  %v435_v39 = vsel %vm235_vm12, %v431_v16, %v1288_v6 }
 0x162   :  { %v443_v23 = vrot.slane %v434_v10, 4  ;;  %v445_v28 = vrot.slane %v435_v39, 4 }
 0x164   :  { %v444_v48 = vsel %vm145_vm4, %v441_v12, %v443_v23  ;;  %v446_v58 = vsel %vm145_vm4, %v443_v23, %v445_v28 }
 0x165   :  { %v454_v27 = vpack.c.bf16 %v444_v48, %v442_v11  ;;  %v455_v31 = vpack.c.bf16 %v446_v58, %v446_v58 }
 0x167   :  { %1134 = vmatprep.mubr.msk.bf16.mxu0 %vm484_vm13, %v454_v27 }
 0x168   :  { %1135 = vmatmul.mubr.msk.bf16.gmra.mrb[4].mxu0 %vm484_vm13, %v455_v31 }
 0x22e   :  { %v1132_v7 = vpop.f32.mrb[0].mxu0 }
 0x22f   :  { %v572_v38 = vmul.f32 %v1132_v7, %v1096_v36  ;;  %v534_v18 = vpop.f32.mrb[1].mxu0 }
 0x230   :  { %v570_v42 = vmul.f32 %v1096_v36, %v534_v18  ;;  %v1133_v44 = vpop.f32.mrb[2].mxu0 }
 0x231   :  { %v585_v8 = vadd.f32 %v1822_v37, %v572_v38  ;;  %v573_v62 = vmul.f32 %v1133_v44, %v1096_v36  ;;  %v537_v22 = vpop.f32.mrb[3].mxu0 }
 0x232   :  { %v583_v46 = vadd.f32 %v1822_v37, %v570_v42  ;;  %v571_v47 = vmul.f32 %v1096_v36, %v537_v22 }
 0x233   :  { %v592_v49 = vmax.f32 %v585_v8, 0.0  ;;  %v586_v30 = vadd.f32 %v1822_v37, %v573_v62 }
 0x234   :  { %v590_v51 = vmax.f32 %v583_v46, 0.0  ;;  %v584_v9 = vadd.f32 %v1822_v37, %v571_v47 }
 0x235   :  { %v593_v52 = vmax.f32 %v586_v30, 0.0  ;;  %v604_v55 = vrot.slane %v592_v49, 7 }
 0x236   :  { %v601_v50 = vrot.slane %v590_v51, 7  ;;  %v591_v34 = vmax.f32 %v584_v9, 0.0 }
 0x237   :  { %v606_v25 = vrot.slane %v593_v52, 7  ;;  %v733_v33 = vrot.slane %v593_v52, 3 }
 0x238   :  { %v1832_v56 = vsel %vm69_vm0, 0.0, %v601_v50  ;;  %v602_v19 = vrot.slane %v591_v34, 7 }
 0x239   :  { %v607_v41 = vsel %vm69_vm0, %v604_v55, %v606_v25  ;;  %v632_v57 = vrot.slane %v1832_v56, 2  ;;  %v616_v59 = vrot.slane %v1832_v56, 1  ;;  %v664_v40 = vrot.slane %v1832_v56, 4 }
 0x23a   :  { %v1839_v60 = vsel %vm69_vm0, %v601_v50, %v602_v19  ;;  %v1842_v45 = vsel %vm69_vm0, %v602_v19, %v604_v55  ;;  %v648_v61 = vrot.slane %v1832_v56, 3  ;;  %v1879_v62 = vsel %vm125_vm3, %v607_v41, 0.0 }
 0x23b   :  { %v1136_v63 = vpop.f32.mrb[4].mxu0  ;;  %v633_v17 = vrot.slane %v1839_v60, 2  ;;  %v635_v32 = vrot.slane %v1842_v45, 2  ;;  %v617_v0 = vrot.slane %v1839_v60, 1  ;;  %v619_v43 = vrot.slane %v1842_v45, 1 }
 0x23c   :  { %v576_v1 = vmul.f32 %v1136_v63, %v1096_v36  ;;  %v550_v53 = vpop.f32.mrb[5].mxu0  ;;  %v665_v4 = vrot.slane %v1839_v60, 4  ;;  %v667_v6 = vrot.slane %v1842_v45, 4  ;;  %v649_v13 = vrot.slane %v1839_v60, 3 }
 0x23d   :  { %v574_v29 = vmul.f32 %v1096_v36, %v550_v53  ;;  %v1137_v54 = vpop.f32.mrb[6].mxu0  ;;  %v634_v12 = vsel %vm105_vm1, %v632_v57, %v633_v17  ;;  %v636_v14 = vsel %vm105_vm1, %v633_v17, %v635_v32  ;;  %v618_v16 = vsel %vm85_vm2, %v616_v59, %v617_v0 }
 0x23e   :  { %v589_v10 = vadd.f32 %v1822_v37, %v576_v1  ;;  %v553_v39 = vpop.f32.mrb[7].mxu0  ;;  %v1294_v23 = vpack.i.bf16 %v636_v14, %v634_v12  ;;  %v620_v28 = vsel %vm85_vm2, %v617_v0, %v619_v43  ;;  %v666_v11 = vsel %vm145_vm4, %v664_v40, %v665_v4 }
 0x23f   :  { %v587_v48 = vadd.f32 %v1822_v37, %v574_v29  ;;  %v575_v58 = vmul.f32 %v1096_v36, %v553_v39  ;;  %v1289_v27 = vpack.i.bf16 %v620_v28, %v618_v16  ;;  %v668_v31 = vsel %vm145_vm4, %v665_v4, %v667_v6 }
 0x240   :  { %v596_v7 = vmax.f32 %v589_v10, 0.0  ;;  %1295 = vrot.lane.b32.xlu0 %v1294_v23, %s1411_s0  ;;  %v650_v38 = vsel %vm125_vm3, %v648_v61, %v649_v13  ;;  %v651_v18 = vrot.slane %v1842_v45, 3  ;;  %v696_v36 = vrot.slane %v1832_v56, 6 }
 0x241   :  { %v594_v42 = vmax.f32 %v587_v48, 0.0  ;;  %v588_v44 = vadd.f32 %v1822_v37, %v575_v58  ;;  %1290 = vrot.lane.b32.xlu1 %v1289_v27, %s1412_s28  ;;  %v697_v8 = vrot.slane %v1839_v60, 6  ;;  %v1304_v22 = vpack.i.bf16 %v668_v31, %v666_v11 }
 0x242   :  { %v652_v46 = vsel %vm125_vm3, %v649_v13, %v651_v18  ;;  %v699_v47 = vrot.slane %v1842_v45, 6  ;;  %v680_v52 = vrot.slane %v1832_v56, 5  ;;  %v681_v50 = vrot.slane %v1839_v60, 5 }
 0x243   :  { %v734_v49 = vrot.slane %v594_v42, 3  ;;  %v595_v30 = vmax.f32 %v588_v44, 0.0  ;;  %v1299_v51 = vpack.i.bf16 %v652_v46, %v650_v38  ;;  %v698_v37 = vsel %vm188_vm6, %v696_v36, %v697_v8 }
 0x244   :  { %1305 = vrot.lane.b32.xlu0 %v1304_v22, %s1414_s30  ;;  %v700_v9 = vsel %vm188_vm6, %v697_v8, %v699_v47  ;;  %v683_v34 = vrot.slane %v1842_v45, 5  ;;  %v738_v21 = vrot.slane %v596_v7, 3  ;;  %v637_v19 = vrot.slane %v1879_v62, 2 }
 0x245   :  { %v735_v55 = vsel %vm125_vm3, %v733_v33, %v734_v49  ;;  %v736_v25 = vrot.slane %v595_v30, 3  ;;  %1300 = vrot.lane.b32.xlu1 %v1299_v51, %s1413_s29  ;;  %v1314_v57 = vpack.i.bf16 %v700_v9, %v698_v37  ;;  %v682_v59 = vsel %vm166_vm5, %v680_v52, %v681_v50  ;;  %v1386_v52 = vld [vmem:[%s2065_s4 + $0x18] ss:$0 sps:$4 sm:$0xff]  }
 0x246   :  { %v1897_v41 = vsel %vm69_vm0, 0.0, %v735_v55  ;;  %v684_v40 = vsel %vm166_vm5, %v681_v50, %v683_v34  ;;  %v621_v17 = vrot.slane %v1879_v62, 1  ;;  %v638_v4 = vsel %vm105_vm1, %v635_v32, %v637_v19 }
 0x247   :  { %v1902_v61 = vsel %vm125_vm3, %v734_v49, %v736_v25  ;;  %v1905_v24 = vsel %vm125_vm3, %v736_v25, %v738_v21  ;;  %v1309_v63 = vpack.i.bf16 %v684_v40, %v682_v59  ;;  %v764_v0 = vrot.slane %v1897_v41, 2 }
 0x248   :  { %1315 = vrot.lane.b32.xlu0 %v1314_v57, %s1416_s9  ;;  %v765_v1 = vrot.slane %v1902_v61, 2  ;;  %v748_v53 = vrot.slane %v1897_v41, 1  ;;  %v749_v13 = vrot.slane %v1902_v61, 1  ;;  %v796_v29 = vrot.slane %v1897_v41, 4 }
 0x249   :  { %1310 = vrot.lane.b32.xlu1 %v1309_v63, %s1415_s8  ;;  %v797_v54 = vrot.slane %v1902_v61, 4  ;;  %v669_v14 = vrot.slane %v1879_v62, 4  ;;  %v780_v16 = vrot.slane %v1897_v41, 3  ;;  %v781_v10 = vrot.slane %v1902_v61, 3 }
 0x24a   :  { %v766_v12 = vsel %vm105_vm1, %v764_v0, %v765_v1  ;;  %v622_v23 = vsel %vm85_vm2, %v619_v43, %v621_v17  ;;  %v750_v32 = vsel %vm85_vm2, %v748_v53, %v749_v13  ;;  %v653_v28 = vrot.slane %v1879_v62, 3 }
 0x24b   :  { %v1324_v39 = vpack.i.bf16 %v766_v12, %v638_v4  ;;  %v1319_v11 = vpack.i.bf16 %v750_v32, %v622_v23  ;;  %v798_v48 = vsel %vm145_vm4, %v796_v29, %v797_v54  ;;  %v782_v58 = vsel %vm125_vm3, %v780_v16, %v781_v10 }
 0x24c   :  { %v828_v27 = vrot.slane %v1897_v41, 6  ;;  %v829_v31 = vrot.slane %v1902_v61, 6  ;;  %v670_v43 = vsel %vm145_vm4, %v667_v6, %v669_v14  ;;  %v701_v33 = vrot.slane %v1879_v62, 6 }
 0x24d   :  { %1325 = vrot.lane.b32.xlu0 %v1324_v39, %s1411_s0  ;;  %1320 = vrot.lane.b32.xlu1 %v1319_v11, %s1412_s28  ;;  %v812_v7 = vrot.slane %v1897_v41, 5  ;;  %v813_v38 = vrot.slane %v1902_v61, 5  ;;  %v745_v42 = vsel %vm125_vm3, %v738_v21, 0.0  ;;  %v1334_v44 = vpack.i.bf16 %v798_v48, %v670_v43 }
 0x24e   :  { %v654_v36 = vsel %vm125_vm3, %v651_v18, %v653_v28  ;;  %v685_v8 = vrot.slane %v1879_v62, 5  ;;  %v830_v46 = vsel %vm188_vm6, %v828_v27, %v829_v31  ;;  %v767_v6 = vrot.slane %v1905_v24, 2 }
 0x24f   :  { %v1329_v22 = vpack.i.bf16 %v782_v58, %v654_v36  ;;  %v814_v49 = vsel %vm166_vm5, %v812_v7, %v813_v38  ;;  %v751_v30 = vrot.slane %v1905_v24, 1  ;;  %v702_v51 = vsel %vm188_vm6, %v699_v47, %v701_v33 }
 0x250   :  { %v769_v18 = vrot.slane %v745_v42, 2  ;;  %v1344_v37 = vpack.i.bf16 %v830_v46, %v702_v51  ;;  %v686_v62 = vsel %vm166_vm5, %v683_v34, %v685_v8  ;;  %v753_v9 = vrot.slane %v745_v42, 1 }
 0x251   :  { %1335 = vrot.lane.b32.xlu0 %v1334_v44, %s1414_s30  ;;  %1330 = vrot.lane.b32.xlu1 %v1329_v22, %s1413_s29  ;;  %v1339_v50 = vpack.i.bf16 %v814_v49, %v686_v62  ;;  %v768_v21 = vsel %vm105_vm1, %v765_v1, %v767_v6  ;;  %v799_v25 = vrot.slane %v1905_v24, 4  ;;  %v752_v47 = vsel %vm85_vm2, %v749_v13, %v751_v30 }
 0x252   :  { %v770_v55 = vsel %vm105_vm1, %v767_v6, %v769_v18  ;;  %v754_v19 = vsel %vm85_vm2, %v751_v30, %v753_v9  ;;  %v783_v34 = vrot.slane %v1905_v24, 3  ;;  %v801_v57 = vrot.slane %v745_v42, 4 }
 0x253   :  { %v1354_v59 = vpack.i.bf16 %v770_v55, %v768_v21  ;;  %v785_v40 = vrot.slane %v745_v42, 3  ;;  %v903_v63 = vsel %vm145_vm4, %v1386_v52, 0  ;;  %v1349_v17 = vpack.i.bf16 %v754_v19, %v752_v47 }
 0x254   :  { %v800_v0 = vsel %vm145_vm4, %v797_v54, %v799_v25  ;;  %v802_v1 = vsel %vm145_vm4, %v799_v25, %v801_v57  ;;  %v831_v53 = vrot.slane %v1905_v24, 6  ;;  %1145 = vmatpush3.bf16.msra.mxu1 %v903_v63  ;;  %v784_v4 = vsel %vm125_vm3, %v781_v10, %v783_v34 }
 0x255   :  { %1345 = vrot.lane.b32.xlu0 %v1344_v37, %s1416_s9  ;;  %1340 = vrot.lane.b32.xlu1 %v1339_v50, %s1415_s8  ;;  %v786_v13 = vsel %vm125_vm3, %v783_v34, %v785_v40  ;;  %v815_v29 = vrot.slane %v1905_v24, 5  ;;  %v833_v54 = vrot.slane %v745_v42, 6  ;;  %v1364_v12 = vpack.i.bf16 %v802_v1, %v800_v0 }
 0x256   :  { %v817_v14 = vrot.slane %v745_v42, 5  ;;  %v1359_v16 = vpack.i.bf16 %v786_v13, %v784_v4  ;;  %v832_v39 = vsel %vm188_vm6, %v829_v31, %v831_v53 }
 0x257   :  { %v834_v23 = vsel %vm188_vm6, %v831_v53, %v833_v54  ;;  %v816_v32 = vsel %vm166_vm5, %v813_v38, %v815_v29 }
 0x258   :  { %v818_v10 = vsel %vm166_vm5, %v815_v29, %v817_v14  ;;  %v1374_v28 = vpack.i.bf16 %v834_v23, %v832_v39 }
 0x259   :  { %1355 = vrot.lane.b32.xlu0 %v1354_v59, %s1411_s0  ;;  %1350 = vrot.lane.b32.xlu1 %v1349_v17, %s1412_s28  ;;  %v1369_v11 = vpack.i.bf16 %v818_v10, %v816_v32 }
 0x25d   :  { %1365 = vrot.lane.b32.xlu0 %v1364_v12, %s1414_s30  ;;  %1360 = vrot.lane.b32.xlu1 %v1359_v16, %s1413_s29 }
 0x261   :  { %1375 = vrot.lane.b32.xlu0 %v1374_v28, %s1416_s9  ;;  %1370 = vrot.lane.b32.xlu1 %v1369_v11, %s1415_s8 }
 0x2b2   :  { %v1296_v48 = vpop.permute.xlu0 %1295 }
 0x2b3   :  { %v1291_v58 = vpop.permute.xlu1 %1290  ;;  %v1298_v43 = vunpack.i.h.bf16 %v1296_v48  ;;  %v1297_v33 = vunpack.i.l.bf16 %v1296_v48 }
 0x2b4   :  { %v1293_v27 = vunpack.i.h.bf16 %v1291_v58  ;;  %v1292_v31 = vunpack.i.l.bf16 %v1291_v58 }
 0x2b6   :  { %v713_v7 = vsel %vm210_vm7, %v1839_v60, %v1293_v27  ;;  %v712_v38 = vsel %vm210_vm7, %v1832_v56, %v1292_v31  ;;  %v1306_v42 = vpop.permute.xlu0 %1305 }
 0x2b7   :  { %v1301_v44 = vpop.permute.xlu1 %1300  ;;  %v1308_v22 = vunpack.i.h.bf16 %v1306_v42  ;;  %v1307_v46 = vunpack.i.l.bf16 %v1306_v42  ;;  %v715_v6 = vsel %vm215_vm8, %v712_v38, %v1297_v33  ;;  %v716_v49 = vsel %vm215_vm8, %v713_v7, %v1298_v43 }
 0x2b8   :  { %v1303_v36 = vunpack.i.h.bf16 %v1301_v44  ;;  %v1302_v8 = vunpack.i.l.bf16 %v1301_v44 }
 0x2ba   :  { %v718_v30 = vsel %vm220_vm9, %v715_v6, %v1302_v8  ;;  %v719_v51 = vsel %vm220_vm9, %v716_v49, %v1303_v36  ;;  %v1316_v18 = vpop.permute.xlu0 %1315 }
 0x2bb   :  { %v1318_v37 = vunpack.i.h.bf16 %v1316_v18  ;;  %v1317_v60 = vunpack.i.l.bf16 %v1316_v18  ;;  %v1311_v62 = vpop.permute.xlu1 %1310  ;;  %v721_v52 = vsel %vm225_vm10, %v718_v30, %v1307_v46  ;;  %v722_v50 = vsel %vm225_vm10, %v719_v51, %v1308_v22 }
 0x2bc   :  { %v1313_v9 = vunpack.i.h.bf16 %v1311_v62  ;;  %v1312_v56 = vunpack.i.l.bf16 %v1311_v62 }
 0x2be   :  { %v724_v21 = vsel %vm230_vm11, %v721_v52, %v1312_v56  ;;  %v725_v55 = vsel %vm230_vm11, %v722_v50, %v1313_v9 }
 0x2bf   :  { %v1326_v25 = vpop.permute.xlu0 %1325  ;;  %v727_v47 = vsel %vm235_vm12, %v724_v21, %v1317_v60  ;;  %v728_v19 = vsel %vm235_vm12, %v725_v55, %v1318_v37  ;;  %v1321_v34 = vpop.permute.xlu1 %1320 }
 0x2c0   :  { %v862_v57 = vpack.c.bf16 %v728_v19, %v727_v47  ;;  %v1323_v59 = vunpack.i.h.bf16 %v1321_v34  ;;  %v1322_v40 = vunpack.i.l.bf16 %v1321_v34  ;;  %v1328_v63 = vunpack.i.h.bf16 %v1326_v25 }
 0x2c1   :  { %v1327_v17 = vunpack.i.l.bf16 %v1326_v25 }
 0x2c2   :  { %1147 = vmatmul.mubr.msk.bf16.vlgmr.msra.gmra.mrb[0].mxu1 %vm484_vm13, %v862_v57  ;;  %v844_v0 = vsel %vm210_vm7, %v1897_v41, %v1323_v59  ;;  %v714_v1 = vsel %vm210_vm7, %v1842_v45, %v1322_v40 }
 0x2c3   :  { %v1336_v53 = vpop.permute.xlu0 %1335  ;;  %1150 = vmatprep.mubr.msk.bf16.mxu1 %vm1418_vm14, %v1417_v35  ;;  %v1331_v4 = vpop.permute.xlu1 %1330  ;;  %v717_v14 = vsel %vm215_vm8, %v714_v1, %v1327_v17  ;;  %v847_v16 = vsel %vm215_vm8, %v844_v0, %v1328_v63  ;;  %v1105_v63 = vld [vmem:[%s2066_s5] ss:$0 sm:$0xff]  ;;  %s1419_s5 = smov [#allocation2]  }
 0x2c4   :  { %v1333_v13 = vunpack.i.h.bf16 %v1331_v4  ;;  %v1332_v29 = vunpack.i.l.bf16 %v1331_v4  ;;  %v1338_v54 = vunpack.i.h.bf16 %v1336_v53  ;;  %v1337_v12 = vunpack.i.l.bf16 %v1336_v53  ;;  %v1106_v17 = vld [vmem:[%s2067_s6] ss:$0 sm:$0xff]  ;;  %s1076_s6 = sshll.u32 %s1419_s5, 4  ;;  %s1077_s6 = int_to_ptr.vmem [resolvable:$true] %s1076_s6 }
 0x2c5   :  { %s1387_s30 = scalar_lea.vmem %s1077_s6, 256  ;;  %p1392_p1 = scmp.lt.s32.totalorder %s1077_s6, %s1077_s6 }
 0x2c6   :  { %v720_v39 = vsel %vm220_vm9, %v717_v14, %v1332_v29  ;;  %v850_v41 = vsel %vm220_vm9, %v847_v16, %v1333_v13  ;;  %p1388_p0 = scmp.ne.s32.totalorder %s1077_s6, %s1387_s30  ;;  %p1393_p2 = scmp.lt.s32.totalorder %s1387_s30, %s1387_s30 }
 0x2c7   :  { %v1346_v23 = vpop.permute.xlu0 %1345  ;;  %v1341_v10 = vpop.permute.xlu1 %1340  ;;  %v723_v48 = vsel %vm225_vm10, %v720_v39, %v1337_v12  ;;  %v853_v58 = vsel %vm225_vm10, %v850_v41, %v1338_v54 }
 0x2c8   :  { %v1348_v32 = vunpack.i.h.bf16 %v1346_v23  ;;  %v1347_v45 = vunpack.i.l.bf16 %v1346_v23  ;;  %v1343_v28 = vunpack.i.h.bf16 %v1341_v10  ;;  %v1342_v11 = vunpack.i.l.bf16 %v1341_v10  ;;  %p1394_p3 = por %p1393_p2, %p1392_p1 }
 0x2ca   :  { %v726_v27 = vsel %vm230_vm11, %v723_v48, %v1342_v11  ;;  %v856_v31 = vsel %vm230_vm11, %v853_v58, %v1343_v28  ;;  %p1395_p4 = pnand %p1394_p3, %p1388_p0 }
 0x2cb   :  { %v1356_v43 = vpop.permute.xlu0 %1355  ;;  %v1351_v33 = vpop.permute.xlu1 %1350  ;;  %v729_v7 = vsel %vm235_vm12, %v726_v27, %v1347_v45  ;;  %v859_v38 = vsel %vm235_vm12, %v856_v31, %v1348_v32 }
 0x2cc   :  { %v1353_v42 = vunpack.i.h.bf16 %v1351_v33  ;;  %v1352_v44 = vunpack.i.l.bf16 %v1351_v33  ;;  %v863_v36 = vpack.c.bf16 %v859_v38, %v729_v7  ;;  %v1358_v8 = vunpack.i.h.bf16 %v1356_v43 }
 0x2cd   :  { %v1357_v22 = vunpack.i.l.bf16 %v1356_v43 }
 0x2ce   :  { %v846_v46 = vsel %vm210_vm7, %v1905_v24, %v1353_v42  ;;  %v845_v6 = vsel %vm210_vm7, %v1902_v61, %v1352_v44  ;;  %1151 = vmatmul.mubr.msk.bf16.gmra.mrb[4].mxu1 %vm484_vm13, %v863_v36 }
 0x2cf   :  { %v1366_v49 = vpop.permute.xlu0 %1365  ;;  %v1361_v30 = vpop.permute.xlu1 %1360  ;;  %1154 = vmatprep.mubr.msk.bf16.mxu1 %vm1418_vm14, %v1417_v35  ;;  %v848_v62 = vsel %vm215_vm8, %v845_v6, %v1357_v22  ;;  %v849_v9 = vsel %vm215_vm8, %v846_v46, %v1358_v8 }
 0x2d0   :  { %v1363_v51 = vunpack.i.h.bf16 %v1361_v30  ;;  %v1362_v18 = vunpack.i.l.bf16 %v1361_v30  ;;  %v1368_v37 = vunpack.i.h.bf16 %v1366_v49  ;;  %v1367_v60 = vunpack.i.l.bf16 %v1366_v49 }
 0x2d2   :  { %v851_v24 = vsel %vm220_vm9, %v848_v62, %v1362_v18  ;;  %v852_v56 = vsel %vm220_vm9, %v849_v9, %v1363_v51 }
 0x2d3   :  { %v1376_v61 = vpop.permute.xlu0 %1375  ;;  %v1371_v21 = vpop.permute.xlu1 %1370  ;;  %v854_v35 = vsel %vm225_vm10, %v851_v24, %v1367_v60  ;;  %v855_v47 = vsel %vm225_vm10, %v852_v56, %v1368_v37 }
 0x2d4   :  { %v1378_v52 = vunpack.i.h.bf16 %v1376_v61  ;;  %v1377_v50 = vunpack.i.l.bf16 %v1376_v61  ;;  %v1373_v55 = vunpack.i.h.bf16 %v1371_v21  ;;  %v1372_v25 = vunpack.i.l.bf16 %v1371_v21 }
 0x2d6   :  { %v857_v19 = vsel %vm230_vm11, %v854_v35, %v1372_v25  ;;  %v858_v34 = vsel %vm230_vm11, %v855_v47, %v1373_v55 }
 0x2d7   :  { %v860_v57 = vsel %vm235_vm12, %v857_v19, %v1377_v50  ;;  %v861_v59 = vsel %vm235_vm12, %v858_v34, %v1378_v52 }
 0x2d8   :  { %v864_v40 = vpack.c.bf16 %v861_v59, %v860_v57 }
 0x2da   :  { %1155 = vmatmul.mubr.msk.bf16.gmra.mrb[8].mxu1 %vm484_vm13, %v864_v40 }
 0x395   :  { %v939_v0 = vpop.f32.mrb[0].mxu1 }
 0x396   :  { %v968_v1 = vmul.f32 %v1105_v63, %v939_v0  ;;  %v1148_v53 = vpop.f32.mrb[1].mxu1 }
 0x397   :  { %v942_v4 = vpop.f32.mrb[2].mxu1 }
 0x398   :  { %v980_v13 = vadd.f32 %v1106_v17, %v968_v1  ;;  %v969_v29 = vmul.f32 %v1105_v63, %v942_v4  ;;  %v1149_v54 = vpop.f32.mrb[3].mxu1 }
 0x39a   :  { %v986_v12 = vmax.f32 %v980_v13, 0.0  ;;  %v981_v14 = vadd.f32 %v1106_v17, %v969_v29 }
 0x39c   :  { %v987_v16 = vmax.f32 %v981_v14, 0.0  ;;  %v992_v39 = vadd.f32 %v986_v12, %v1467_v2 }
 0x39e   :  { %v995_v41 = vmax.f32 %v992_v39, 0.0  ;;  %v993_v23 = vadd.f32 %v987_v16, %v1469_v3 }
 0x3a0   :  { %998 = vxpose.xlu1.b32.start [1/3] (short) (narrow) %v995_v41, 8  ;;  %v996_v45 = vmax.f32 %v993_v23, 0.0 }
 0x3a1   :  { %v947_v32 = vpop.f32.mrb[4].mxu1 }
 0x3a2   :  { %v970_v10 = vmul.f32 %v1105_v63, %v947_v32  ;;  %v1152_v28 = vpop.f32.mrb[5].mxu1 }
 0x3a3   :  { %v950_v11 = vpop.f32.mrb[6].mxu1 }
 0x3a4   :  { %999 = vxpose.xlu1.b32.cont [2/3] (short) (narrow) %v996_v45, 8  ;;  %v982_v48 = vadd.f32 %v1106_v17, %v970_v10  ;;  %v971_v58 = vmul.f32 %v1105_v63, %v950_v11  ;;  %v1153_v27 = vpop.f32.mrb[7].mxu1 }
 0x3a6   :  { %v988_v31 = vmax.f32 %v982_v48, 0.0  ;;  %v983_v43 = vadd.f32 %v1106_v17, %v971_v58 }
 0x3a8   :  { %v989_v33 = vmax.f32 %v983_v43, 0.0  ;;  %v994_v7 = vadd.f32 %v988_v31, %v1472_v5 }
 0x3aa   :  { %v997_v38 = vmax.f32 %v994_v7, 0.0  ;;  %v1031_v2 = vadd.f32 %v989_v33, %v1492_v15 }
 0x3ac   :  { %1000 = vxpose.xlu1.b32.end [3/3] (short) (narrow) %v997_v38, 8  ;;  %v1034_v3 = vmax.f32 %v1031_v2, 0.0 }
 0x3ad   :  { %v955_v42 = vpop.f32.mrb[8].mxu1 }
 0x3ae   :  { %v972_v44 = vmul.f32 %v1105_v63, %v955_v42  ;;  %1037 = vxpose.xlu0.b32.start [1/3] (short) (narrow) %v1034_v3, 8  ;;  %v1156_v36 = vpop.f32.mrb[9].mxu1 }
 0x3af   :  { %v958_v8 = vpop.f32.mrb[10].mxu1 }
 0x3b0   :  { %v984_v22 = vadd.f32 %v1106_v17, %v972_v44  ;;  %v973_v46 = vmul.f32 %v1105_v63, %v958_v8  ;;  %v1157_v6 = vpop.f32.mrb[11].mxu1 }
 0x3b2   :  { %v990_v49 = vmax.f32 %v984_v22, 0.0  ;;  %v985_v30 = vadd.f32 %v1106_v17, %v973_v46 }
 0x3b4   :  { %v1032_v51 = vadd.f32 %v990_v49, %v1502_v20  ;;  %v991_v18 = vmax.f32 %v985_v30, 0.0 }
 0x3b6   :  { %v1035_v37 = vmax.f32 %v1032_v51, 0.0  ;;  %v1033_v5 = vadd.f32 %v991_v18, %v1515_v26 }
 0x3b8   :  { %1038 = vxpose.xlu0.b32.cont [2/3] (short) (narrow) %v1035_v37, 8  ;;  %v1036_v15 = vmax.f32 %v1033_v5, 0.0 }
 0x3bc   :  { %1039 = vxpose.xlu0.b32.end [3/3] (short) (narrow) %v1036_v15, 8 }
 0x424   :  { %v1014_v60 = vpop.trf.xlu1 }
 0x425   :  { %1030 = vst.msk [vmem:[#allocation2] sm:$0xff] %vm220_vm9, %v1014_v60 }
 0x434   :  { %v1053_v62 = vpop.trf.xlu0 }
 0x435   :  { %1070 = vst.msk [vmem:[#allocation2 + $0x8] sm:$0xff] %vm220_vm9, %v1053_v62 }
 0x436   :  { %1398 = shalt.err (!%p1395_p4)
}
 0x437   :  { %s1399_s10 = scalar_lea.hbm %s2068_s7, 256 }
 0x438   :  { %p1400_p5 = scmp.ne.s32.totalorder %s2068_s7, %s1399_s10  ;;  %p1403_p6 = scmp.lt.u32.totalorder %s1399_s10, %s2068_s7 }
 0x43a   :  { %p1405_p7 = pnand %p1403_p6, %p1400_p5 }
 0x43c   :  { %1408 = shalt.err (!%p1405_p7)
}
 0x43d   :  { %s1420_s15 = smov 128  }
 0x43e   :  { %1082 = dma.vmem_to_hbm [thread:$0]  %s1077_s6, 256, %s2068_s7, [#allocation3], %s1420_s15, %s1420_s15, %s1412_s28  }
 0x43f   :  { %1409 = dma.done.wait [#allocation3], 256  }
 0x440   :  { %1410 = vsyncadd [#allocation3], 4294967040 }
 0x441   :  { %1086 = vsyncpa [#allocation3], 1 }

</bundles_post_ra>
